<compile_context>
chip_gen: v6e
topology: v6e:2x2x1
jax: 0.10.0
libtpu: 0.0.40
codegen_flags: <defaults>
</compile_context>

<pallas_src>
import jax
import jax.numpy as jnp
from jax import lax
from jax.experimental import pallas as pl
from jax.experimental.pallas import tpu as pltpu


def _round_up(x, m):
    return (x + m - 1) // m * m


def _softplus(x):
    # Stable softplus = max(x, 0) + log1p(exp(-|x|)); exp/log go to the EUP slot,
    # never overflows for large positive x.
    return jnp.maximum(x, 0.0) + jnp.log1p(jnp.exp(-jnp.abs(x)))


def _pad2d(a, rows, cols):
    r, c = a.shape
    if r == rows and c == cols:
        return a
    return jnp.pad(a, ((0, rows - r), (0, cols - c)))


def bayes_linear_kernel(x_ref, wmu_ref, wrho_ref, weps_ref,
                        bmu_ref, brho_ref, beps_ref, o_ref, acc_ref):
    k = pl.program_id(2)

    @pl.when(k == 0)
    def _():
        acc_ref[...] = jnp.zeros_like(acc_ref)

    # Reparameterized weight sample for this (out-tile, k-tile): w = mu + softplus(rho) * eps
    w = wmu_ref[...] + _softplus(wrho_ref[...]) * weps_ref[...]

    # y += x @ w.T without materializing the transpose: contract x's K dim (axis 1)
    # against w's K dim (axis 1) on the MXU with f32 accumulation.
    acc_ref[...] += lax.dot_general(
        x_ref[...], w,
        dimension_numbers=(((1,), (1,)), ((), ())),
        preferred_element_type=jnp.float32)

    @pl.when(k == pl.num_programs(2) - 1)
    def _():
        # Reparameterized bias sample + epilogue store (lane-dense tile).
        b = bmu_ref[...] + _softplus(brho_ref[...]) * beps_ref[...]
        o_ref[...] = (acc_ref[...] + b).astype(o_ref.dtype)


def bayes_layer_forward(x, w_mu, w_rho, eps_w, b_mu, b_rho, eps_b,
                        *, tile_m=256, tile_n=256, tile_k=512):
    """x: (B, in); w_*: (out, in); b_*: (out,). Returns (B, out)."""
    B, in_f = x.shape
    out_f = w_mu.shape[0]

    # Align for TPU tiling: batch -> multiple of 8 (sublane), in/out -> multiple of 128 (lane).
    B_p = _round_up(B, 8)
    in_p = _round_up(in_f, 128)
    out_p = _round_up(out_f, 128)
    tm = min(tile_m, B_p)
    tn = min(tile_n, out_p)
    tk = min(tile_k, in_p)
    B_p = _round_up(B_p, tm)     # make tiles divide the padded extents
    out_p = _round_up(out_p, tn)
    in_p = _round_up(in_p, tk)

    # Zero padding is exact: padded weight sample = 0 + softplus(0)*0 = 0, padded x = 0.
    xp = _pad2d(x, B_p, in_p)
    wmu_p = _pad2d(w_mu, out_p, in_p)
    wrho_p = _pad2d(w_rho, out_p, in_p)
    weps_p = _pad2d(eps_w, out_p, in_p)
    bmu_p = _pad2d(b_mu.reshape(1, -1), 1, out_p)
    brho_p = _pad2d(b_rho.reshape(1, -1), 1, out_p)
    beps_p = _pad2d(eps_b.reshape(1, -1), 1, out_p)

    grid = (B_p // tm, out_p // tn, in_p // tk)

    # VMEM budget: double-buffered input tiles + double-buffered output tile + accumulator.
    itemsize = 4
    tile_in_bytes = (tm * tk + 3 * tn * tk + 3 * tn) * itemsize
    tile_out_bytes = tm * tn * itemsize
    vmem_needed = 2 * tile_in_bytes + 2 * tile_out_bytes + tile_out_bytes
    vmem_limit = int(min(max(4 * vmem_needed, 4 << 20), 64 << 20))  # stay under v7x 64 MiB

    cost = pl.CostEstimate(
        flops=2 * B_p * out_p * in_p + 3 * (out_p * in_p + out_p),
        transcendentals=2 * (out_p * in_p + out_p),
        bytes_accessed=itemsize * (B_p * in_p + 3 * out_p * in_p + 3 * out_p
                                   + B_p * out_p),
    )

    y_p = pl.pallas_call(
        bayes_linear_kernel,
        out_shape=jax.ShapeDtypeStruct((B_p, out_p), x.dtype),
        grid_spec=pltpu.PrefetchScalarGridSpec(
            num_scalar_prefetch=0,
            grid=grid,
            in_specs=[
                pl.BlockSpec((tm, tk), lambda i, j, k: (i, k)),   # x
                pl.BlockSpec((tn, tk), lambda i, j, k: (j, k)),   # w_mu
                pl.BlockSpec((tn, tk), lambda i, j, k: (j, k)),   # w_rho
                pl.BlockSpec((tn, tk), lambda i, j, k: (j, k)),   # eps_w
                pl.BlockSpec((1, tn), lambda i, j, k: (0, j)),    # b_mu (k-invariant)
                pl.BlockSpec((1, tn), lambda i, j, k: (0, j)),    # b_rho
                pl.BlockSpec((1, tn), lambda i, j, k: (0, j)),    # eps_b
            ],
            out_specs=pl.BlockSpec((tm, tn), lambda i, j, k: (i, j)),
            scratch_shapes=[pltpu.VMEM((tm, tn), jnp.float32)],
        ),
        compiler_params=pltpu.CompilerParams(
            dimension_semantics=("parallel", "parallel", "arbitrary"),
            vmem_limit_bytes=vmem_limit,
        ),
        cost_estimate=cost,
    )(xp, wmu_p, wrho_p, weps_p, bmu_p, brho_p, beps_p)

    if B_p == B and out_p == out_f:
        return y_p
    return y_p[:B, :out_f]


if __name__ == "__main__":
    key = jax.random.PRNGKey(0)
    k_x, k_wmu, k_wrho, k_bmu, k_brho, k_ew, k_eb = jax.random.split(key, 7)

    # Module sizes (small, consistent with the Linear layer the forward implies)
    batch = 8
    input_features = 32
    output_features = 64

    # Deterministic "parameter init" matching __init__ distributions:
    #   w_mu ~ N(0, 0.1), w_rho ~ N(-3, 0.1), same for biases.
    w_mu = 0.1 * jax.random.normal(k_wmu, (output_features, input_features), jnp.float32)
    w_rho = -3.0 + 0.1 * jax.random.normal(k_wrho, (output_features, input_features), jnp.float32)
    b_mu = 0.1 * jax.random.normal(k_bmu, (output_features,), jnp.float32)
    b_rho = -3.0 + 0.1 * jax.random.normal(k_brho, (output_features,), jnp.float32)

    # Noise for rsample() (sample_weights())
    eps_w = jax.random.normal(k_ew, (output_features, input_features), jnp.float32)
    eps_b = jax.random.normal(k_eb, (output_features,), jnp.float32)

    # Input
    x = jax.random.normal(k_x, (batch, input_features), jnp.float32)

    # Run the Pallas kernel
    y = bayes_layer_forward(x, w_mu, w_rho, eps_w, b_mu, b_rho, eps_b)
    y = jax.block_until_ready(y)

    # Pure-JAX reference check (sample_weights + F.linear)
    w_ref = w_mu + jnp.log(1.0 + jnp.exp(w_rho)) * eps_w
    b_ref = b_mu + jnp.log(1.0 + jnp.exp(b_rho)) * eps_b
    y_ref = x @ w_ref.T + b_ref
    assert y.shape == (batch, output_features)
    assert jnp.allclose(y, y_ref, atol=2e-5, rtol=2e-5), float(jnp.max(jnp.abs(y - y_ref)))

    print("KERNEL_OK")
</pallas_src>

<mosaic_0001>
module attributes {stable_mosaic.version = 11 : i64} {
  func.func @bayes_linear_kernel(%arg0: i32, %arg1: i32, %arg2: i32, %arg3: memref<8x128xf32, #tpu.memory_space<vmem>>, %arg4: memref<128x128xf32, #tpu.memory_space<vmem>>, %arg5: memref<128x128xf32, #tpu.memory_space<vmem>>, %arg6: memref<128x128xf32, #tpu.memory_space<vmem>>, %arg7: memref<1x128xf32, #tpu.memory_space<vmem>>, %arg8: memref<1x128xf32, #tpu.memory_space<vmem>>, %arg9: memref<1x128xf32, #tpu.memory_space<vmem>>, %arg10: memref<8x128xf32, #tpu.memory_space<vmem>>, %arg11: memref<8x128xf32, #tpu.memory_space<vmem>>) attributes {dimension_semantics = [#tpu.dimension_semantics<parallel>, #tpu.dimension_semantics<parallel>, #tpu.dimension_semantics<arbitrary>], iteration_bounds = array<i64: 1, 1, 1>, scalar_prefetch = 0 : i64, scratch_operands = 1 : i64, tpu.core_type = #tpu.core_type<tc>, window_params = [{transform_indices = @transform_0, window_bounds = array<i64: 8, 128>}, {transform_indices = @transform_1, window_bounds = array<i64: 128, 128>}, {transform_indices = @transform_2, window_bounds = array<i64: 128, 128>}, {transform_indices = @transform_3, window_bounds = array<i64: 128, 128>}, {transform_indices = @transform_4, window_bounds = array<i64: 1, 128>}, {transform_indices = @transform_5, window_bounds = array<i64: 1, 128>}, {transform_indices = @transform_6, window_bounds = array<i64: 1, 128>}, {transform_indices = @transform_7, window_bounds = array<i64: 8, 128>}]} {
    %c0_i32 = arith.constant 0 : i32
    %0 = arith.cmpi eq, %arg2, %c0_i32 : i32
    %1 = arith.extui %0 : i1 to i32
    %c0_i32_0 = arith.constant 0 : i32
    %2 = arith.cmpi ne, %1, %c0_i32_0 : i32
    scf.if %2 {
      %cst_16 = arith.constant 0.000000e+00 : f32
      %24 = vector.broadcast %cst_16 : f32 to vector<8x128xf32>
      %c0_17 = arith.constant 0 : index
      %c0_18 = arith.constant 0 : index
      %25 = vector.load %arg11[%c0_17, %c0_18] : memref<8x128xf32, #tpu.memory_space<vmem>>, vector<8x128xf32>
      tpu.vector_store %arg11[%c0_17, %c0_18], %24 {strides = array<i32>} : memref<8x128xf32, #tpu.memory_space<vmem>>, vector<8x128xf32>,
    } else {
    }
    %c0 = arith.constant 0 : index
    %c0_1 = arith.constant 0 : index
    %3 = vector.load %arg4[%c0, %c0_1] : memref<128x128xf32, #tpu.memory_space<vmem>>, vector<128x128xf32>
    %c0_2 = arith.constant 0 : index
    %c0_3 = arith.constant 0 : index
    %4 = vector.load %arg5[%c0_2, %c0_3] : memref<128x128xf32, #tpu.memory_space<vmem>>, vector<128x128xf32>
    %cst = arith.constant 0.000000e+00 : f32
    %5 = vector.broadcast %cst : f32 to vector<128x128xf32>
    %6 = arith.maximumf %4, %5 : vector<128x128xf32>
    %7 = math.absf %4 : vector<128x128xf32>
    %cst_4 = arith.constant 0.000000e+00 : f32
    %8 = vector.broadcast %cst_4 : f32 to vector<128x128xf32>
    %9 = arith.subf %8, %7 : vector<128x128xf32>
    %10 = math.exp %9 : vector<128x128xf32>
    %11 = math.log1p %10 : vector<128x128xf32>
    %12 = arith.addf %6, %11 : vector<128x128xf32>
    %c0_5 = arith.constant 0 : index
    %c0_6 = arith.constant 0 : index
    %13 = vector.load %arg6[%c0_5, %c0_6] : memref<128x128xf32, #tpu.memory_space<vmem>>, vector<128x128xf32>
    %14 = arith.mulf %12, %13 : vector<128x128xf32>
    %15 = arith.addf %3, %14 : vector<128x128xf32>
    %c0_7 = arith.constant 0 : index
    %c0_8 = arith.constant 0 : index
    %16 = vector.load %arg11[%c0_7, %c0_8] : memref<8x128xf32, #tpu.memory_space<vmem>>, vector<8x128xf32>
    %c0_9 = arith.constant 0 : index
    %c0_10 = arith.constant 0 : index
    %17 = vector.load %arg3[%c0_9, %c0_10] : memref<8x128xf32, #tpu.memory_space<vmem>>, vector<8x128xf32>
    %cst_11 = arith.constant dense<0.000000e+00> : vector<8x128xf32>
    %18 = tpu.matmul %17, %15, %cst_11 {dimension_numbers = #tpu.dot_dimension_numbers<[1], [1], [0], [0], [0, 0, 1, 0], [], []>} : vector<8x128xf32>, vector<128x128xf32>, vector<8x128xf32> -> vector<8x128xf32>
    %19 = arith.addf %16, %18 : vector<8x128xf32>
    %c0_12 = arith.constant 0 : index
    %c0_13 = arith.constant 0 : index
    %20 = vector.load %arg11[%c0_12, %c0_13] : memref<8x128xf32, #tpu.memory_space<vmem>>, vector<8x128xf32>
    tpu.vector_store %arg11[%c0_12, %c0_13], %19 {strides = array<i32>} : memref<8x128xf32, #tpu.memory_space<vmem>>, vector<8x128xf32>,
    %c0_i32_14 = arith.constant 0 : i32
    %21 = arith.cmpi eq, %arg2, %c0_i32_14 : i32
    %22 = arith.extui %21 : i1 to i32
    %c0_i32_15 = arith.constant 0 : i32
    %23 = arith.cmpi ne, %22, %c0_i32_15 : i32
    scf.if %23 {
      %c0_16 = arith.constant 0 : index
      %c0_17 = arith.constant 0 : index
      %24 = vector.load %arg7[%c0_16, %c0_17] : memref<1x128xf32, #tpu.memory_space<vmem>>, vector<1x128xf32>
      %c0_18 = arith.constant 0 : index
      %c0_19 = arith.constant 0 : index
      %25 = vector.load %arg8[%c0_18, %c0_19] : memref<1x128xf32, #tpu.memory_space<vmem>>, vector<1x128xf32>
      %cst_20 = arith.constant 0.000000e+00 : f32
      %26 = vector.broadcast %cst_20 : f32 to vector<1x128xf32>
      %27 = arith.maximumf %25, %26 : vector<1x128xf32>
      %28 = math.absf %25 : vector<1x128xf32>
      %cst_21 = arith.constant 0.000000e+00 : f32
      %29 = vector.broadcast %cst_21 : f32 to vector<1x128xf32>
      %30 = arith.subf %29, %28 : vector<1x128xf32>
      %31 = math.exp %30 : vector<1x128xf32>
      %32 = math.log1p %31 : vector<1x128xf32>
      %33 = arith.addf %27, %32 : vector<1x128xf32>
      %c0_22 = arith.constant 0 : index
      %c0_23 = arith.constant 0 : index
      %34 = vector.load %arg9[%c0_22, %c0_23] : memref<1x128xf32, #tpu.memory_space<vmem>>, vector<1x128xf32>
      %35 = arith.mulf %33, %34 : vector<1x128xf32>
      %36 = arith.addf %24, %35 : vector<1x128xf32>
      %c0_24 = arith.constant 0 : index
      %c0_25 = arith.constant 0 : index
      %37 = vector.load %arg11[%c0_24, %c0_25] : memref<8x128xf32, #tpu.memory_space<vmem>>, vector<8x128xf32>
      %38 = vector.broadcast %36 : vector<1x128xf32> to vector<8x128xf32>
      %39 = arith.addf %37, %38 : vector<8x128xf32>
      %c0_26 = arith.constant 0 : index
      %c0_27 = arith.constant 0 : index
      %40 = vector.load %arg10[%c0_26, %c0_27] : memref<8x128xf32, #tpu.memory_space<vmem>>, vector<8x128xf32>
      tpu.vector_store %arg10[%c0_26, %c0_27], %39 {strides = array<i32>} : memref<8x128xf32, #tpu.memory_space<vmem>>, vector<8x128xf32>,
    } else {
    }
    return
  }
  func.func @transform_0(%arg0: i32, %arg1: i32, %arg2: i32) -> (i32, i32) {
    %c0_i32 = arith.constant 0 : i32
    return %arg0, %arg2 : i32, i32
  }
  func.func @transform_1(%arg0: i32, %arg1: i32, %arg2: i32) -> (i32, i32) {
    %c0_i32 = arith.constant 0 : i32
    return %arg1, %arg2 : i32, i32
  }
  func.func @transform_2(%arg0: i32, %arg1: i32, %arg2: i32) -> (i32, i32) {
    %c0_i32 = arith.constant 0 : i32
    return %arg1, %arg2 : i32, i32
  }
  func.func @transform_3(%arg0: i32, %arg1: i32, %arg2: i32) -> (i32, i32) {
    %c0_i32 = arith.constant 0 : i32
    return %arg1, %arg2 : i32, i32
  }
  func.func @transform_4(%arg0: i32, %arg1: i32, %arg2: i32) -> (i32, i32) {
    %c0_i32 = arith.constant 0 : i32
    %c0_i32_0 = arith.constant 0 : i32
    return %c0_i32, %arg1 : i32, i32
  }
  func.func @transform_5(%arg0: i32, %arg1: i32, %arg2: i32) -> (i32, i32) {
    %c0_i32 = arith.constant 0 : i32
    %c0_i32_0 = arith.constant 0 : i32
    return %c0_i32, %arg1 : i32, i32
  }
  func.func @transform_6(%arg0: i32, %arg1: i32, %arg2: i32) -> (i32, i32) {
    %c0_i32 = arith.constant 0 : i32
    %c0_i32_0 = arith.constant 0 : i32
    return %c0_i32, %arg1 : i32, i32
  }
  func.func @transform_7(%arg0: i32, %arg1: i32, %arg2: i32) -> (i32, i32) {
    %c0_i32 = arith.constant 0 : i32
    return %arg0, %arg1 : i32, i32
  }
}

</mosaic_0001>

<bundles_post_ra>
// kernel: tpu_custom_call.1
= control target key start
LH: loop header
LB: loop body
LE: loop exit
PB: predicated region body
PF: predicated region fallthrough
CT: control target
= control target key end

     0   :  { %12 = vsyncpa [#allocation4], 0  ;;  %s1096_s0 = inlined_call_operand.hbm [shape: f32[8,128], index: 0, kind: input, shape index: {}]   ;;  %s1097_s1 = inlined_call_operand.hbm [shape: f32[128,128], index: 1, kind: input, shape index: {}]   ;;  %s1098_s2 = inlined_call_operand.hbm [shape: f32[128,128], index: 2, kind: input, shape index: {}]   ;;  %s1099_s3 = inlined_call_operand.hbm [shape: f32[128,128], index: 3, kind: input, shape index: {}]   ;;  %s1100_s4 = inlined_call_operand.vmem [shape: f32[1,128], index: 4, kind: input, shape index: {}]   ;;  %s1101_s5 = inlined_call_operand.vmem [shape: f32[1,128], index: 5, kind: input, shape index: {}]   ;;  %s1102_s6 = inlined_call_operand.vmem [shape: f32[1,128], index: 6, kind: input, shape index: {}]   ;;  %s1103_s7 = inlined_call_operand.hbm [shape: f32[8,128], index: 7, kind: output, shape index: {}]  }
   0x1   :  { %13 = vsyncpa [#allocation7], 0 }
   0x2   :  { %14 = vsyncpa [#allocation10], 0 }
   0x3   :  { %15 = vsyncpa [#allocation5], 0  ;;  %s765_s24 = smov [#allocation6]  }
   0x4   :  { %s31_s25 = sshll.u32 %s765_s24, 4  ;;  %s32_s25 = int_to_ptr.vmem [resolvable:$true] %s31_s25 }
   0x5   :  { %s665_s26 = scalar_lea.vmem %s32_s25, 2048  ;;  %p670_p1 = scmp.lt.s32.totalorder %s32_s25, %s32_s25 }
   0x6   :  { %p666_p0 = scmp.ne.s32.totalorder %s32_s25, %s665_s26  ;;  %p671_p2 = scmp.lt.s32.totalorder %s665_s26, %s665_s26 }
   0x8   :  { %p672_p3 = por %p671_p2, %p670_p1 }
   0xa   :  { %p673_p4 = pnand %p672_p3, %p666_p0 }
   0xc   :  { %676 = shalt.err (!%p673_p4)
}
   0xd   :  { %s766_s27 = smov 128   ;;  %s767_s28 = smov 8  }
   0xe   :  { %37 = dma.hbm_to_vmem [thread:$0]  %s1097_s1, 2048, %s32_s25, [#allocation7], %s766_s27, %s766_s27, %s767_s28  }
   0xf   :  { %s768_s8 = smov [#allocation3]   ;;  %s769_s10 = smov [#allocation8]  }
  0x10   :  { %s22_s9 = sshll.u32 %s768_s8, 4  ;;  %s43_s11 = sshll.u32 %s769_s10, 4  ;;  %s23_s9 = int_to_ptr.vmem [resolvable:$true] %s22_s9  ;;  %s44_s11 = int_to_ptr.vmem [resolvable:$true] %s43_s11 }
  0x11   :  { %s685_s12 = scalar_lea.vmem %s23_s9, 128  ;;  %p690_p6 = scmp.lt.s32.totalorder %s23_s9, %s23_s9 }
  0x12   :  { %p686_p5 = scmp.ne.s32.totalorder %s23_s9, %s685_s12  ;;  %p691_p7 = scmp.lt.s32.totalorder %s685_s12, %s685_s12 }
  0x14   :  { %p692_p8 = por %p691_p7, %p690_p6 }
  0x16   :  { %p693_p9 = pnand %p692_p8, %p686_p5 }
  0x18   :  { %696 = shalt.err (!%p693_p9)
}
  0x19   :  { %25 = dma.hbm_to_vmem [thread:$0]  %s1096_s0, 128, %s23_s9, [#allocation4]  }
  0x1a   :  { %s705_s15 = scalar_lea.vmem %s44_s11, 2048  ;;  %p710_p11 = scmp.lt.s32.totalorder %s44_s11, %s44_s11 }
  0x1b   :  { %p706_p10 = scmp.ne.s32.totalorder %s44_s11, %s705_s15  ;;  %p711_p12 = scmp.lt.s32.totalorder %s705_s15, %s705_s15 }
  0x1d   :  { %p712_p13 = por %p711_p12, %p710_p11 }
  0x1f   :  { %p713_p0 = pnand %p712_p13, %p706_p10 }
  0x21   :  { %716 = shalt.err (!%p713_p0)
}
  0x22   :  { %49 = dma.hbm_to_vmem [thread:$0]  %s1098_s2, 2048, %s44_s11, [#allocation7], %s766_s27, %s766_s27, %s767_s28  }
  0x23   :  { %s770_s17 = smov [#allocation9]  }
  0x24   :  { %s55_s18 = sshll.u32 %s770_s17, 4  ;;  %s56_s18 = int_to_ptr.vmem [resolvable:$true] %s55_s18 }
  0x25   :  { %s725_s19 = scalar_lea.vmem %s56_s18, 2048  ;;  %p730_p2 = scmp.lt.s32.totalorder %s56_s18, %s56_s18 }
  0x26   :  { %p726_p1 = scmp.ne.s32.totalorder %s56_s18, %s725_s19  ;;  %p731_p3 = scmp.lt.s32.totalorder %s725_s19, %s725_s19 }
  0x28   :  { %p732_p4 = por %p731_p3, %p730_p2 }
  0x2a   :  { %p733_p5 = pnand %p732_p4, %p726_p1 }
  0x2c   :  { %736 = shalt.err (!%p733_p5)
}
  0x2d   :  { %61 = dma.hbm_to_vmem [thread:$0]  %s1099_s3, 2048, %s56_s18, [#allocation10], %s766_s27, %s766_s27, %s767_s28  }
  0x2e   :  { %757 = dma.done.wait [#allocation4], 128  }
  0x2f   :  { %758 = vsyncadd [#allocation4], 4294967168 }
  0x30   :  { %759 = dma.done.wait [#allocation7], 4096  }
  0x31   :  { %760 = vsyncadd [#allocation7], 4294963200 }
  0x32   :  { %761 = dma.done.wait [#allocation10], 2048  }
  0x33   :  { %762 = vsyncadd [#allocation10], 4294965248  ;;  %v771_v0 = vmov 0.0   ;;  %vm772_vm0 = vmmov 0   ;;  %v837_v1 = vld [vmem:[#allocation8 + $0x78] sm:$0xff]  ;;  %v840_v3 = vld [vmem:[#allocation8 + $0x70] sm:$0xff] }
  0x34   :  { %545 = vmatprep.subr.mxu0 %v771_v0  ;;  %577 = vmatprep.mubr.msk.f32.mxu0 %vm772_vm0, %v771_v0  ;;  %v148_v2 = vand.u32 2147483647, %v837_v1  ;;  %v147_v4 = vand.u32 2147483647, %v840_v3  ;;  %v843_v5 = vld [vmem:[#allocation8 + $0x68] sm:$0xff]  ;;  %v846_v8 = vld [vmem:[#allocation8 + $0x60] sm:$0xff] }
  0x35   :  { %v146_v7 = vand.u32 2147483647, %v843_v5  ;;  %v145_v10 = vand.u32 2147483647, %v846_v8  ;;  %v849_v13 = vld [vmem:[#allocation8 + $0x58] sm:$0xff]  ;;  %v852_v18 = vld [vmem:[#allocation8 + $0x50] sm:$0xff] }
  0x36   :  { %v164_v6 = vsub.f32 0.0, %v148_v2  ;;  %v163_v9 = vsub.f32 0.0, %v147_v4  ;;  %v144_v16 = vand.u32 2147483647, %v849_v13  ;;  %v854_v21 = vld [vmem:[#allocation8 + $0x48] sm:$0xff]  ;;  %v858_v25 = vld [vmem:[#allocation8 + $0x40] sm:$0xff] }
  0x37   :  { %v162_v12 = vsub.f32 0.0, %v146_v7  ;;  %v161_v15 = vsub.f32 0.0, %v145_v10  ;;  %v143_v22 = vand.u32 2147483647, %v852_v18  ;;  %v142_v23 = vand.u32 2147483647, %v854_v21 }
  0x38   :  { %v195_v11 = vmul.f32 1.442695, %v164_v6  ;;  %v193_v14 = vmul.f32 1.442695, %v163_v9  ;;  %v160_v20 = vsub.f32 0.0, %v144_v16  ;;  %v861_v29 = vld [vmem:[#allocation8 + $0x38] sm:$0xff] }
  0x39   :  { %v191_v17 = vmul.f32 1.442695, %v162_v12  ;;  %v189_v19 = vmul.f32 1.442695, %v161_v15  ;;  %v159_v26 = vsub.f32 0.0, %v143_v22  ;;  %v158_v27 = vsub.f32 0.0, %v142_v23 }
  0x3a   :  { %589 = vpow2.f32 %v195_v11  ;;  %v187_v24 = vmul.f32 1.442695, %v160_v20  ;;  %v141_v28 = vand.u32 2147483647, %v858_v25  ;;  %v140_v30 = vand.u32 2147483647, %v861_v29 }
  0x3b   :  { %591 = vpow2.f32 %v193_v14  ;;  %v864_v31 = vld [vmem:[#allocation8 + $0x30] sm:$0xff]  ;;  %v185_v32 = vmul.f32 1.442695, %v159_v26  ;;  %v183_v33 = vmul.f32 1.442695, %v158_v27  ;;  %v867_v37 = vld [vmem:[#allocation8 + $0x28] sm:$0xff] }
  0x3c   :  { %593 = vpow2.f32 %v191_v17  ;;  %v157_v34 = vsub.f32 0.0, %v141_v28  ;;  %v156_v35 = vsub.f32 0.0, %v140_v30  ;;  %v139_v36 = vand.u32 2147483647, %v864_v31  ;;  %v872_v51 = vld [vmem:[#allocation8 + $0x20] sm:$0xff]  ;;  %v886_v4 = vld [vmem:[#allocation8 + $0x18] sm:$0xff] }
  0x3d   :  { %595 = vpow2.f32 %v189_v19  ;;  %v138_v39 = vand.u32 2147483647, %v867_v37  ;;  %v137_v55 = vand.u32 2147483647, %v872_v51  ;;  %v132_v59 = vmax.f32 %v837_v1, 0.0  ;;  %v892_v14 = vld [vmem:[#allocation8 + $0x10] sm:$0xff] }
  0x3e   :  { %597 = vpow2.f32 %v187_v24  ;;  %v181_v38 = vmul.f32 1.442695, %v157_v34  ;;  %v179_v40 = vmul.f32 1.442695, %v156_v35  ;;  %v155_v41 = vsub.f32 0.0, %v139_v36  ;;  %s773_s24 = smov [#allocation11]  }
  0x3f   :  { %599 = vpow2.f32 %v185_v32  ;;  %v154_v43 = vsub.f32 0.0, %v138_v39  ;;  %v131_v62 = vmax.f32 %v840_v3, 0.0  ;;  %v130_v7 = vmax.f32 %v843_v5, 0.0  ;;  %s517_s25 = sshll.u32 %s773_s24, 4  ;;  %s518_s25 = int_to_ptr.vmem [resolvable:$true] %s517_s25 }
  0x40   :  { %601 = vpow2.f32 %v183_v33  ;;  %v177_v48 = vmul.f32 1.442695, %v155_v41  ;;  %v129_v9 = vmax.f32 %v846_v8, 0.0  ;;  %v153_v10 = vsub.f32 0.0, %v137_v55  ;;  %v372_v55 = vld [vmem:[#allocation9 + $0x78] sm:$0xff]  ;;  %s737_s26 = scalar_lea.vmem %s518_s25, 128  ;;  %p742_p7 = scmp.lt.s32.totalorder %s518_s25, %s518_s25 }
  0x41   :  { %603 = vpow2.f32 %v181_v38  ;;  %v175_v52 = vmul.f32 1.442695, %v154_v43  ;;  %v136_v19 = vand.u32 2147483647, %v886_v4  ;;  %v128_v23 = vmax.f32 %v849_v13, 0.0  ;;  %p738_p6 = scmp.ne.s32.totalorder %s518_s25, %s737_s26  ;;  %p743_p8 = scmp.lt.s32.totalorder %s737_s26, %s737_s26 }
  0x42   :  { %605 = vpow2.f32 %v179_v40  ;;  %v173_v26 = vmul.f32 1.442695, %v153_v10  ;;  %v135_v27 = vand.u32 2147483647, %v892_v14  ;;  %v127_v36 = vmax.f32 %v852_v18, 0.0 }
  0x43   :  { %p744_p9 = por %p743_p8, %p742_p7 }
  0x45   :  { %p745_p10 = pnand %p744_p9, %p738_p6 }
  0x47   :  { %v590_v42 = vpop.eup %589 }
  0x48   :  { %v592_v44 = vpop.eup %591  ;;  %v332_v45 = vadd.f32 1.0, %v590_v42  ;;  %v335_v56 = vmul.f32 -0.5, %v590_v42  ;;  %v338_v6 = vand.u32 2147483647, %v590_v42 }
  0x49   :  { %v594_v46 = vpop.eup %593  ;;  %v323_v47 = vadd.f32 1.0, %v592_v44  ;;  %v326_v60 = vmul.f32 -0.5, %v592_v44  ;;  %v329_v16 = vand.u32 2147483647, %v592_v44 }
  0x4a   :  { %v870_v49 = vpop.eup %595  ;;  %607 = vlog2.f32 %v332_v45  ;;  %v314_v50 = vadd.f32 1.0, %v594_v46  ;;  %v317_v63 = vmul.f32 -0.5, %v594_v46  ;;  %v336_v11 = vadd.f32 1.0, %v335_v56 }
  0x4b   :  { %609 = vlog2.f32 %v323_v47  ;;  %v874_v53 = vpop.eup %597  ;;  %v305_v54 = vadd.f32 1.0, %v870_v49  ;;  %v308_v1 = vmul.f32 -0.5, %v870_v49  ;;  %v327_v15 = vadd.f32 1.0, %v326_v60 }
  0x4c   :  { %611 = vlog2.f32 %v314_v50  ;;  %v296_v57 = vadd.f32 1.0, %v874_v53  ;;  %v879_v58 = vpop.eup %599  ;;  %v299_v17 = vmul.f32 -0.5, %v874_v53  ;;  %v318_v5 = vadd.f32 1.0, %v317_v63 }
  0x4d   :  { %613 = vpow2.f32 %v177_v48  ;;  %v882_v61 = vpop.eup %601  ;;  %v287_v2 = vadd.f32 1.0, %v879_v58  ;;  %v320_v20 = vand.u32 2147483647, %v594_v46  ;;  %v311_v22 = vand.u32 2147483647, %v870_v49 }
  0x4e   :  { %615 = vlog2.f32 %v305_v54  ;;  %v278_v12 = vadd.f32 1.0, %v882_v61  ;;  %v894_v3 = vpop.eup %603  ;;  %vm900_vm1 = vcmp.lt.f32.partialorder %v338_v6, 0.0004427343  ;;  %v337_v30 = vmul.f32 %v590_v42, %v336_v11  ;;  %v371_v6 = vld [vmem:[#allocation9 + $0x70] sm:$0xff]  ;;  %v369_v42 = vld [vmem:[#allocation9 + $0x60] sm:$0xff] }
  0x4f   :  { %617 = vpow2.f32 %v175_v52  ;;  %v905_v28 = vpop.eup %605  ;;  %v309_v32 = vadd.f32 1.0, %v308_v1  ;;  %v269_v33 = vadd.f32 1.0, %v894_v3  ;;  %v328_v35 = vmul.f32 %v592_v44, %v327_v15 }
  0x50   :  { %619 = vlog2.f32 %v296_v57  ;;  %vm908_vm2 = vcmp.lt.f32.partialorder %v329_v16, 0.0004427343  ;;  %v300_v38 = vadd.f32 1.0, %v299_v17  ;;  %v290_v39 = vmul.f32 -0.5, %v879_v58 }
  0x51   :  { %621 = vlog2.f32 %v287_v2  ;;  %v319_v43 = vmul.f32 %v594_v46, %v318_v5  ;;  %vm913_vm3 = vcmp.lt.f32.partialorder %v320_v20, 0.0004427343  ;;  %vm917_vm4 = vcmp.lt.f32.partialorder %v311_v22, 0.0004427343  ;;  %v99_v22 = vld [vmem:[#allocation6 + $0x70] sm:$0xff] }
  0x52   :  { %623 = vlog2.f32 %v278_v12  ;;  %v302_v48 = vand.u32 2147483647, %v874_v53  ;;  %v260_v50 = vadd.f32 1.0, %v905_v28  ;;  %v152_v52 = vsub.f32 0.0, %v136_v19  ;;  %v100_v12 = vld [vmem:[#allocation6 + $0x78] sm:$0xff] }
  0x53   :  { %v310_v57 = vmul.f32 %v870_v49, %v309_v32  ;;  %625 = vlog2.f32 %v269_v33  ;;  %v301_v10 = vmul.f32 %v874_v53, %v300_v38  ;;  %v291_v11 = vadd.f32 1.0, %v290_v39  ;;  %v370_v53 = vld [vmem:[#allocation9 + $0x68] sm:$0xff] }
  0x54   :  { %v281_v49 = vmul.f32 -0.5, %v882_v61  ;;  %627 = vlog2.f32 %v260_v50  ;;  %vm939_vm5 = vcmp.lt.f32.partialorder %v302_v48, 0.0004427343  ;;  %v955_v48 = vld [vmem:[#allocation8 + $0x8] sm:$0xff]  ;;  %v284_v8 = vand.u32 2147483647, %v882_v61 }
  0x55   :  { %629 = vpow2.f32 %v173_v26  ;;  %v292_v38 = vmul.f32 %v879_v58, %v291_v11  ;;  %v98_v26 = vld [vmem:[#allocation6 + $0x68] sm:$0xff] }
  0x56   :  { %v282_v39 = vadd.f32 1.0, %v281_v49  ;;  %vm974_vm7 = vcmp.lt.f32.partialorder %v284_v8, 0.0004427343 }
  0x57   :  { %v608_v34 = vpop.eup %607 }
  0x58   :  { %v610_v40 = vpop.eup %609  ;;  %v334_v41 = vmul.f32 0.6931472, %v608_v34 }
  0x59   :  { %v612_v47 = vpop.eup %611  ;;  %v325_v44 = vmul.f32 0.6931472, %v610_v40  ;;  %v272_v40 = vmul.f32 -0.5, %v894_v3 }
  0x5a   :  { %v923_v54 = vpop.eup %613  ;;  %v340_v46 = vsel %vm900_vm1, %v337_v30, %v334_v41  ;;  %v316_v56 = vmul.f32 0.6931472, %v612_v47 }
  0x5b   :  { %v616_v60 = vpop.eup %615  ;;  %v356_v63 = vadd.f32 %v340_v46, %v132_v59  ;;  %v331_v2 = vsel %vm908_vm2, %v328_v35, %v325_v44  ;;  %v251_v20 = vadd.f32 1.0, %v923_v54  ;;  %v293_v35 = vand.u32 2147483647, %v879_v58 }
  0x5c   :  { %v931_v1 = vpop.eup %617  ;;  %v355_v15 = vadd.f32 %v331_v2, %v131_v62  ;;  %v322_v16 = vsel %vm913_vm3, %v319_v43, %v316_v56  ;;  %v307_v17 = vmul.f32 0.6931472, %v616_v60  ;;  %v171_v44 = vmul.f32 1.442695, %v152_v52  ;;  %v968_v2 = vld [vmem:[#allocation8] sm:$0xff] }
  0x5d   :  { %v620_v19 = vpop.eup %619  ;;  %v388_v5 = vmul.f32 %v372_v55, %v356_v63  ;;  %v354_v59 = vadd.f32 %v322_v16, %v130_v7  ;;  %v242_v7 = vadd.f32 1.0, %v931_v1  ;;  %631 = vlog2.f32 %v251_v20 }
  0x5e   :  { %v387_v24 = vmul.f32 %v371_v6, %v355_v15  ;;  %v313_v30 = vsel %vm917_vm4, %v310_v57, %v307_v17  ;;  %v298_v32 = vmul.f32 0.6931472, %v620_v19  ;;  %v622_v62 = vpop.eup %621  ;;  %v151_v58 = vsub.f32 0.0, %v135_v27  ;;  %v97_v6 = vld [vmem:[#allocation6 + $0x60] sm:$0xff] }
  0x5f   :  { %v404_v33 = vadd.f32 %v388_v5, %v100_v12  ;;  %v386_v43 = vmul.f32 %v370_v53, %v354_v59  ;;  %v353_v45 = vadd.f32 %v313_v30, %v129_v9  ;;  %v289_v18 = vmul.f32 0.6931472, %v622_v62  ;;  %v624_v50 = vpop.eup %623  ;;  %v367_v53 = vld [vmem:[#allocation9 + $0x50] sm:$0xff] }
  0x60   :  { %v403_v41 = vadd.f32 %v387_v24, %v99_v22  ;;  %v304_v47 = vsel %vm939_vm5, %v301_v10, %v298_v32  ;;  %vm957_vm6 = vcmp.lt.f32.partialorder %v293_v35, 0.0004427343  ;;  %v275_v9 = vand.u32 2147483647, %v894_v3  ;;  %v368_v10 = vld [vmem:[#allocation9 + $0x58] sm:$0xff]  ;;  %v626_v15 = vpop.eup %625 }
  0x61   :  { %546 = vmatpush3.xpose.msra.mxu0 %v404_v33  ;;  %633 = vlog2.f32 %v242_v7  ;;  %v283_v55 = vmul.f32 %v882_v61, %v282_v39  ;;  %v263_v56 = vmul.f32 -0.5, %v905_v28  ;;  %v169_v52 = vmul.f32 1.442695, %v151_v58  ;;  %v628_v24 = vpop.eup %627 }
  0x62   :  { %547 = vmatprep.subr.mxu0 %v771_v0  ;;  %635 = vpow2.f32 %v171_v44  ;;  %v402_v27 = vadd.f32 %v386_v43, %v98_v26  ;;  %v385_v57 = vmul.f32 %v369_v42, %v353_v45  ;;  %v352_v60 = vadd.f32 %v304_v47, %v128_v23  ;;  %v988_v34 = vpop.eup %629  ;;  %v366_v47 = vld [vmem:[#allocation9 + $0x48] sm:$0xff] }
  0x63   :  { %v134_v63 = vand.u32 2147483647, %v955_v48  ;;  %v295_v61 = vsel %vm957_vm6, %v292_v38, %v289_v18  ;;  %v280_v11 = vmul.f32 0.6931472, %v624_v50  ;;  %v273_v12 = vadd.f32 1.0, %v272_v40 }
  0x64   :  { %637 = vpow2.f32 %v169_v52  ;;  %v126_v16 = vmax.f32 %v854_v21, 0.0  ;;  %v264_v23 = vadd.f32 1.0, %v263_v56  ;;  %v254_v17 = vmul.f32 -0.5, %v923_v54  ;;  %v96_v21 = vld [vmem:[#allocation6 + $0x58] sm:$0xff] }
  0x65   :  { %548 = vmatpush3.xpose.msra.mxu0 %v403_v41  ;;  %v150_v49 = vsub.f32 0.0, %v134_v63  ;;  %v133_v19 = vand.u32 2147483647, %v968_v2  ;;  %v401_v5 = vadd.f32 %v385_v57, %v97_v6  ;;  %v384_v59 = vmul.f32 %v368_v10, %v352_v60  ;;  %v94_v60 = vld [vmem:[#allocation6 + $0x48] sm:$0xff]  ;;  %v365_v63 = vld [vmem:[#allocation9 + $0x40] sm:$0xff] }
  0x66   :  { %549 = vmatprep.subr.mxu0 %v771_v0  ;;  %v351_v20 = vadd.f32 %v295_v61, %v127_v36  ;;  %vm980_vm8 = vcmp.lt.f32.partialorder %v275_v9, 0.0004427343  ;;  %v286_v30 = vsel %vm974_vm7, %v283_v55, %v280_v11  ;;  %v271_v32 = vmul.f32 0.6931472, %v626_v15 }
  0x67   :  { %v274_v62 = vmul.f32 %v894_v3, %v273_v12  ;;  %v167_v33 = vmul.f32 1.442695, %v150_v49  ;;  %v125_v35 = vmax.f32 %v858_v25, 0.0  ;;  %v266_v7 = vand.u32 2147483647, %v905_v28  ;;  %v95_v25 = vld [vmem:[#allocation6 + $0x50] sm:$0xff] }
  0x68   :  { %v257_v36 = vand.u32 2147483647, %v923_v54  ;;  %v149_v38 = vsub.f32 0.0, %v133_v19  ;;  %v265_v39 = vmul.f32 %v905_v28, %v264_v23  ;;  %v255_v40 = vadd.f32 1.0, %v254_v17  ;;  %v93_v49 = vld [vmem:[#allocation6 + $0x40] sm:$0xff]  ;;  %v364_v19 = vld [vmem:[#allocation9 + $0x38] sm:$0xff] }
  0x69   :  { %550 = vmatpush3.xpose.msra.mxu0 %v402_v27  ;;  %v245_v41 = vmul.f32 -0.5, %v931_v1  ;;  %v233_v26 = vadd.f32 1.0, %v988_v34  ;;  %v400_v43 = vadd.f32 %v384_v59, %v96_v21  ;;  %v383_v3 = vmul.f32 %v367_v53, %v351_v20 }
  0x6a   :  { %551 = vmatprep.subr.mxu0 %v771_v0  ;;  %v350_v45 = vadd.f32 %v286_v30, %v126_v16  ;;  %639 = vpow2.f32 %v167_v33  ;;  %v632_v42 = vpop.eup %631  ;;  %v277_v18 = vsel %vm980_vm8, %v274_v62, %v271_v32  ;;  %v262_v44 = vmul.f32 0.6931472, %v628_v24  ;;  %v363_v32 = vld [vmem:[#allocation9 + $0x30] sm:$0xff] }
  0x6b   :  { %641 = vlog2.f32 %v233_v26  ;;  %v165_v28 = vmul.f32 1.442695, %v149_v38  ;;  %vm999_vm9 = vcmp.lt.f32.partialorder %v266_v7, 0.0004427343  ;;  %v124_v46 = vmax.f32 %v861_v29, 0.0 }
  0x6c   :  { %v256_v8 = vmul.f32 %v923_v54, %v255_v40  ;;  %vm1005_vm10 = vcmp.lt.f32.partialorder %v257_v36, 0.0004427343  ;;  %v399_v56 = vadd.f32 %v383_v3, %v95_v25  ;;  %v382_v52 = vmul.f32 %v366_v47, %v350_v45  ;;  %v362_v47 = vld [vmem:[#allocation9 + $0x28] sm:$0xff] }
  0x6d   :  { %552 = vmatpush3.xpose.msra.mxu0 %v401_v5  ;;  %643 = vpow2.f32 %v165_v28  ;;  %v349_v27 = vadd.f32 %v277_v18, %v125_v35  ;;  %v253_v57 = vmul.f32 0.6931472, %v632_v42  ;;  %v268_v29 = vsel %vm999_vm9, %v265_v39, %v262_v44  ;;  %v91_v42 = vld [vmem:[#allocation6 + $0x30] sm:$0xff]  ;;  %v358_v39 = vld [vmem:[#allocation9 + $0x8] sm:$0xff] }
  0x6e   :  { %553 = vmatprep.subr.mxu0 %v771_v0  ;;  %v634_v50 = vpop.eup %633  ;;  %v246_v54 = vadd.f32 1.0, %v245_v41  ;;  %v236_v6 = vmul.f32 -0.5, %v988_v34  ;;  %v248_v11 = vand.u32 2147483647, %v931_v1  ;;  %v123_v12 = vmax.f32 %v864_v31, 0.0 }
  0x6f   :  { %v1009_v55 = vpop.eup %635  ;;  %v398_v16 = vadd.f32 %v382_v52, %v94_v60  ;;  %v381_v13 = vmul.f32 %v365_v63, %v349_v27  ;;  %v348_v23 = vadd.f32 %v268_v29, %v124_v46  ;;  %v259_v17 = vsel %vm1005_vm10, %v256_v8, %v253_v57  ;;  %v90_v57 = vld [vmem:[#allocation6 + $0x28] sm:$0xff]  ;;  %v361_v60 = vld [vmem:[#allocation9 + $0x20] sm:$0xff] }
  0x70   :  { %v224_v10 = vadd.f32 1.0, %v1009_v55  ;;  %v244_v5 = vmul.f32 0.6931472, %v634_v50  ;;  %v247_v59 = vmul.f32 %v931_v1, %v246_v54  ;;  %v237_v20 = vadd.f32 1.0, %v236_v6  ;;  %v92_v1 = vld [vmem:[#allocation6 + $0x38] sm:$0xff] }
  0x71   :  { %554 = vmatpush3.xpose.msra.mxu0 %v400_v43  ;;  %v1016_v61 = vpop.eup %637  ;;  %vm1025_vm11 = vcmp.lt.f32.partialorder %v248_v11, 0.0004427343  ;;  %v239_v22 = vand.u32 2147483647, %v988_v34  ;;  %v347_v24 = vadd.f32 %v259_v17, %v123_v12  ;;  %v227_v21 = vmul.f32 -0.5, %v1009_v55 }
  0x72   :  { %555 = vmatprep.subr.mxu0 %v771_v0  ;;  %645 = vlog2.f32 %v224_v10  ;;  %v215_v15 = vadd.f32 1.0, %v1016_v61  ;;  %v397_v53 = vadd.f32 %v381_v13, %v93_v49  ;;  %v380_v30 = vmul.f32 %v364_v19, %v348_v23  ;;  %v360_v23 = vld [vmem:[#allocation9 + $0x18] sm:$0xff] }
  0x73   :  { %v122_v62 = vmax.f32 %v867_v37, 0.0  ;;  %v250_v35 = vsel %vm1025_vm11, %v247_v59, %v244_v5  ;;  %v238_v7 = vmul.f32 %v988_v34, %v237_v20  ;;  %v218_v36 = vmul.f32 -0.5, %v1016_v61 }
  0x74   :  { %647 = vlog2.f32 %v215_v15  ;;  %vm1039_vm12 = vcmp.lt.f32.partialorder %v239_v22, 0.0004427343  ;;  %v379_v37 = vmul.f32 %v363_v32, %v347_v24  ;;  %v121_v41 = vmax.f32 %v872_v51, 0.0  ;;  %v88_v24 = vld [vmem:[#allocation6 + $0x18] sm:$0xff] }
  0x75   :  { %556 = vmatpush3.xpose.msra.mxu0 %v399_v56  ;;  %v228_v43 = vadd.f32 1.0, %v227_v21  ;;  %v396_v45 = vadd.f32 %v380_v30, %v92_v1  ;;  %v346_v34 = vadd.f32 %v250_v35, %v122_v62  ;;  %v230_v25 = vand.u32 2147483647, %v1009_v55  ;;  %v359_v21 = vld [vmem:[#allocation9 + $0x10] sm:$0xff] }
  0x76   :  { %557 = vmatprep.subr.mxu0 %v771_v0  ;;  %v219_v44 = vadd.f32 1.0, %v218_v36  ;;  %v221_v28 = vand.u32 2147483647, %v1016_v61  ;;  %v395_v58 = vadd.f32 %v379_v37, %v91_v42  ;;  %v120_v50 = vmax.f32 %v886_v4, 0.0  ;;  %v85_v42 = vld [vmem:[#allocation6] sm:$0xff] }
  0x77   :  { %v1032_v33 = vpop.eup %639  ;;  %v229_v46 = vmul.f32 %v1009_v55, %v228_v43  ;;  %v378_v9 = vmul.f32 %v362_v47, %v346_v34  ;;  %vm1055_vm13 = vcmp.lt.f32.partialorder %v230_v25, 0.0004427343  ;;  %v119_v6 = vmax.f32 %v892_v14, 0.0  ;;  %v357_v43 = vld [vmem:[#allocation9] sm:$0xff]  ;;  %v406_v25 = vld [vmem:[#allocation3] sm:$0xff] }
  0x78   :  { %v642_v38 = vpop.eup %641  ;;  %v206_v40 = vadd.f32 1.0, %v1032_v33  ;;  %v209_v27 = vmul.f32 -0.5, %v1032_v33  ;;  %v220_v4 = vmul.f32 %v1016_v61, %v219_v44  ;;  %vm1062_vm14 = vcmp.lt.f32.partialorder %v221_v28, 0.0004427343  ;;  %v89_v61 = vld [vmem:[#allocation6 + $0x20] sm:$0xff] }
  0x79   :  { %558 = vmatpush3.xpose.msra.mxu0 %v398_v16  ;;  %v235_v26 = vmul.f32 0.6931472, %v642_v38  ;;  %v394_v12 = vadd.f32 %v378_v9, %v90_v57  ;;  %v212_v49 = vand.u32 2147483647, %v1032_v33  ;;  %v117_v32 = vmax.f32 %v968_v2, 0.0  ;;  %v86_v2 = vld [vmem:[#allocation6 + $0x8] sm:$0xff] }
  0x7a   :  { %559 = vmatprep.subr.mxu0 %v771_v0  ;;  %v1045_v3 = vpop.eup %643  ;;  %649 = vlog2.f32 %v206_v40  ;;  %v210_v13 = vadd.f32 1.0, %v209_v27  ;;  %v483_v47 = vld [vmem:[%s1101_s5] sm:$0x1] }
  0x7b   :  { %v241_v18 = vsel %vm1039_vm12, %v238_v7, %v235_v26  ;;  %v197_v51 = vadd.f32 1.0, %v1045_v3  ;;  %v200_v11 = vmul.f32 -0.5, %v1045_v3  ;;  %v203_v14 = vand.u32 2147483647, %v1045_v3  ;;  %v482_v55 = vld [vmem:[%s1100_s4] sm:$0x1] }
  0x7c   :  { %v345_v56 = vadd.f32 %v241_v18, %v121_v41  ;;  %v211_v31 = vmul.f32 %v1032_v33, %v210_v13  ;;  %vm213_vm15 = vcmp.lt.f32.partialorder %v212_v49, 0.0004427343  ;;  %v87_v33 = vld [vmem:[#allocation6 + $0x10] sm:$0xff]  ;;  %v485_v18 = vand.u32 2147483647, %v483_v47 }
  0x7d   :  { %560 = vmatpush3.xpose.msra.mxu0 %v397_v53  ;;  %651 = vlog2.f32 %v197_v51  ;;  %v201_v19 = vadd.f32 1.0, %v200_v11  ;;  %v118_v53 = vmax.f32 %v955_v48, 0.0  ;;  %vm204_vm0 = vcmp.lt.f32.partialorder %v203_v14, 0.0004427343 }
  0x7e   :  { %561 = vmatprep.subr.mxu0 %v771_v0  ;;  %v377_v15 = vmul.f32 %v361_v60, %v345_v56  ;;  %v486_v44 = vsub.f32 0.0, %v485_v18  ;;  %v484_v52 = vmax.f32 %v483_v47, 0.0  ;;  %v504_v60 = vlaneseq }
  0x7f   :  { %v646_v8 = vpop.eup %645  ;;  %v202_v62 = vmul.f32 %v1045_v3, %v201_v19 }
  0x80   :  { %v226_v63 = vmul.f32 0.6931472, %v646_v8  ;;  %v393_v5 = vadd.f32 %v377_v15, %v89_v61  ;;  %v487_v51 = vmul.f32 1.442695, %v486_v44 }
  0x81   :  { %562 = vmatpush3.xpose.msra.mxu0 %v396_v45  ;;  %v648_v29 = vpop.eup %647 }
  0x82   :  { %563 = vmatprep.subr.mxu0 %v771_v0  ;;  %v232_v54 = vsel %vm1055_vm13, %v229_v46, %v226_v63  ;;  %v217_v10 = vmul.f32 0.6931472, %v648_v29  ;;  %653 = vpow2.f32 %v487_v51  ;;  %v499_v63 = vld [vmem:[%s1102_s6] sm:$0x1]  ;;  %v505_v29 = vshrl.u32 %v504_v60, 7 }
  0x83   :  { %v344_v16 = vadd.f32 %v232_v54, %v120_v50 }
  0x84   :  { %v223_v17 = vsel %vm1062_vm14, %v220_v4, %v217_v10 }
  0x85   :  { %564 = vmatpush3.xpose.msra.mxu0 %v395_v58  ;;  %v376_v59 = vmul.f32 %v360_v23, %v344_v16  ;;  %v343_v20 = vadd.f32 %v223_v17, %v119_v6  ;;  %v506_v6 = vsub.s32 0, %v505_v29 }
  0x86   :  { %565 = vmatprep.subr.mxu0 %v771_v0 }
  0x87   :  { %v650_v22 = vpop.eup %649  ;;  %v392_v35 = vadd.f32 %v376_v59, %v88_v24  ;;  %v375_v7 = vmul.f32 %v359_v21, %v343_v20 }
  0x88   :  { %v208_v30 = vmul.f32 0.6931472, %v650_v22 }
  0x89   :  { %566 = vmatpush3.xpose.msra.mxu0 %v394_v12  ;;  %v391_v48 = vadd.f32 %v375_v7, %v87_v33 }
  0x8a   :  { %567 = vmatprep.subr.mxu0 %v771_v0  ;;  %v652_v1 = vpop.eup %651  ;;  %v214_v36 = vsel %vm213_vm15, %v211_v31, %v208_v30 }
  0x8b   :  { %v342_v38 = vadd.f32 %v214_v36, %v118_v53  ;;  %v199_v40 = vmul.f32 0.6931472, %v652_v1 }
  0x8d   :  { %568 = vmatpush3.xpose.msra.mxu0 %v393_v5  ;;  %v205_v37 = vsel %vm204_vm0, %v202_v62, %v199_v40  ;;  %v374_v41 = vmul.f32 %v358_v39, %v342_v38 }
  0x8e   :  { %569 = vmatprep.subr.mxu0 %v771_v0  ;;  %v341_v26 = vadd.f32 %v205_v37, %v117_v32 }
  0x8f   :  { %v390_v3 = vadd.f32 %v374_v41, %v86_v2  ;;  %v654_v28 = vpop.eup %653 }
  0x90   :  { %v373_v45 = vmul.f32 %v357_v43, %v341_v26  ;;  %v489_v58 = vadd.f32 1.0, %v654_v28  ;;  %v492_v50 = vmul.f32 -0.5, %v654_v28  ;;  %v495_v9 = vand.u32 2147483647, %v654_v28 }
  0x91   :  { %570 = vmatpush3.xpose.msra.mxu0 %v392_v35 }
  0x92   :  { %571 = vmatprep.subr.mxu0 %v771_v0  ;;  %v389_v34 = vadd.f32 %v373_v45, %v85_v42  ;;  %655 = vlog2.f32 %v489_v58  ;;  %v493_v46 = vadd.f32 1.0, %v492_v50  ;;  %vm496_vm1 = vcmp.lt.f32.partialorder %v495_v9, 0.0004427343 }
  0x95   :  { %572 = vmatpush3.xpose.msra.mxu0 %v391_v48 }
  0x96   :  { %573 = vmatprep.subr.mxu0 %v771_v0 }
  0x99   :  { %574 = vmatpush3.xpose.msra.mxu0 %v390_v3 }
  0x9a   :  { %575 = vmatprep.subr.mxu0 %v771_v0  ;;  %v494_v0 = vmul.f32 %v654_v28, %v493_v46 }
  0x9d   :  { %576 = vmatpush3.xpose.msra.mxu0 %v389_v34 }
  0x9f   :  { %v656_v8 = vpop.eup %655 }
  0xa0   :  { %578 = vmatmul.mubr.f32.vlgmr.msra.gmra.mxu0 %v406_v25  ;;  %v491_v56 = vmul.f32 0.6931472, %v656_v8 }
  0xa2   :  { %v497_v27 = vsel %vm496_vm1, %v494_v0, %v491_v56 }
  0xa3   :  { %v498_v57 = vadd.f32 %v497_v27, %v484_v52 }
  0xa5   :  { %v500_v4 = vmul.f32 %v499_v63, %v498_v57 }
  0xa7   :  { %v501_v54 = vadd.f32 %v500_v4, %v482_v55 }
  0xa9   :  { %v507_v10 = vrot.slane %v501_v54, %v506_v6 }
 0x160   :  { %v473_v11 = vpop.f32.mrf.mxu0 }
 0x161   :  { %v509_v12 = vadd.f32 %v507_v10, %v473_v11 }
 0x162   :  { %v579_v15 = vpop.f32.mrf.mxu0 }
 0x163   :  { %510 = vst [vmem:[#allocation11] sm:$0xff] %v509_v12 }
 0x164   :  { %748 = shalt.err (!%p745_p10)
}
 0x165   :  { %520 = dma.vmem_to_hbm [thread:$0]  %s518_s25, 128, %s1103_s7, [#allocation5]  }
 0x166   :  { %763 = dma.done.wait [#allocation5], 128  }
 0x167   :  { %764 = vsyncadd [#allocation5], 4294967168 }
 0x168   :  { %524 = vsyncpa [#allocation4], 1 }
 0x169   :  { %525 = vsyncpa [#allocation7], 1 }
 0x16a   :  { %526 = vsyncpa [#allocation10], 1 }
 0x16b   :  { %527 = vsyncpa [#allocation5], 1 }

</bundles_post_ra>
